<compile_context>
chip_gen: v7x
topology: tpu7x:2x2x1
jax: 0.10.0
libtpu: 0.0.40
codegen_flags: <defaults>
</compile_context>

<pallas_src>
import functools

import numpy as np
import jax
import jax.numpy as jnp
from jax.experimental import pallas as pl
from jax.experimental.pallas import tpu as pltpu


def _round_up(n, m):
    return ((n + m - 1) // m) * m


# ----------------------------- fused Pallas kernel ---------------------------

def _make_fused_kernel(layout, has_ds, kernel_size, T, mm_dtype):
    """Builds the fused forward kernel.

    Refs: x (batch_tile*T, Cin), blob (R, 128) packed params, out
    (batch_tile, WN_pad).  `layout[name] = (row_start, rows, cols)` gives the
    static slice of each parameter inside the blob.
    """
    n_blocks = len(has_ds)

    def kernel(x_ref, blob_ref, out_ref):

        def get(name):
            r0, nr, nc = layout[name]
            return blob_ref[r0:r0 + nr, 0:nc]

        def mm(a, b):
            # f32 accumulate always; operands optionally bf16 on v6e/v7x.
            return jnp.dot(a.astype(mm_dtype), b.astype(mm_dtype),
                           preferred_element_type=jnp.float32)

        h = x_ref[...].astype(jnp.float32)               # (BT, Cin)
        bt = h.shape[0]

        # Time position of each row within its window (rows are b-major, t-minor).
        tpos = jax.lax.broadcasted_iota(jnp.int32, (bt, 1), 0) % T
        mask_cache = {}                                  # hoisted / reused masks

        def shifted(v, s):
            # v[t] -> v[t - s] within each window; zero where t (mod T) < s.
            if s == 0:
                return v
            if s not in mask_cache:
                mask_cache[s] = tpos >= s
            rolled = pltpu.roll(v, shift=s, axis=0)      # XLU sublane rotate
            return jnp.where(mask_cache[s], rolled, 0.0)

        def conv_relu(v, wname, bname, dilation):
            # Conv1d(k, dilation, padding=(k-1)*dilation) + Chomp1d + ReLU,
            # as ONE matmul on the tap-concatenated activations.
            taps = [shifted(v, (kernel_size - 1 - j) * dilation)
                    for j in range(kernel_size)]
            cat = taps[0] if kernel_size == 1 else jnp.concatenate(taps, axis=1)
            acc = mm(cat, get(wname)) + get(bname)       # bias added once
            return jnp.maximum(acc, 0.0)

        for i in range(n_blocks):
            d = 2 ** i
            h1 = conv_relu(h, f"w1_{i}", f"b1_{i}", d)
            h2 = conv_relu(h1, f"w2_{i}", f"b2_{i}", d)
            if has_ds[i]:                                # 1x1 downsample conv
                res = mm(h, get(f"wd_{i}")) + get(f"bd_{i}")
            else:
                res = h
            h = jnp.maximum(h2 + res, 0.0)
            # Dropout(p=0.2) is identity at inference time.

        # AdaptiveAvgPool1d(1): per-window mean over time as a small matmul.
        pooled = mm(get("pool"), h)                      # (batch_tile, Clast)
        emb = mm(pooled, get("we")) + get("be")          # (batch_tile, emb)
        dec = mm(emb, get("wdec")) + get("bdec")         # (batch_tile, WN_pad)
        out_ref[...] = dec                               # lane-dense store

    return kernel


# ------------------------- host-side parameter packing -----------------------

def pack_params(params, *, kernel_size, window_size, num_inputs, T, batch_tile):
    """Packs all weights/biases/pool-matrix into one lane-dense (R, 128) blob."""
    blocks = params["blocks"]
    has_ds = tuple("wd" in blk for blk in blocks)

    WN = window_size * num_inputs
    WN_pad = _round_up(WN, 128)

    entries = []
    for i, blk in enumerate(blocks):
        w1 = np.asarray(blk["w1"], np.float32)           # (k, Cin, Cout)
        w2 = np.asarray(blk["w2"], np.float32)
        entries.append((f"w1_{i}", w1.reshape(w1.shape[0] * w1.shape[1], w1.shape[2])))
        entries.append((f"b1_{i}", np.asarray(blk["b1"], np.float32)))
        entries.append((f"w2_{i}", w2.reshape(w2.shape[0] * w2.shape[1], w2.shape[2])))
        entries.append((f"b2_{i}", np.asarray(blk["b2"], np.float32)))
        if "wd" in blk:
            entries.append((f"wd_{i}", np.asarray(blk["wd"], np.float32)))
            entries.append((f"bd_{i}", np.asarray(blk["bd"], np.float32)))

    # Per-tile pooling matrix: block-diagonal 1/T rows.
    pool = np.zeros((batch_tile, batch_tile * T), np.float32)
    for b in range(batch_tile):
        pool[b, b * T:(b + 1) * T] = 1.0 / T
    entries.append(("pool", pool))

    entries.append(("we", np.asarray(params["enc"]["we"], np.float32)))
    entries.append(("be", np.asarray(params["enc"]["be"], np.float32)))

    # Pad decoder weights so the kernel's only HBM store is 128-lane dense.
    wdec = np.asarray(params["dec"]["wd"], np.float32)
    bdec = np.asarray(params["dec"]["bd"], np.float32)
    wdec = np.pad(wdec, ((0, 0), (0, WN_pad - WN)))
    bdec = np.pad(bdec, ((0, 0), (0, WN_pad - WN)))
    entries.append(("wdec", wdec))
    entries.append(("bdec", bdec))

    blob_cols = _round_up(max(a.shape[1] for _, a in entries), 128)
    layout = {}
    chunks = []
    r = 0
    for name, a in entries:
        nr, nc = a.shape
        nr_pad = _round_up(nr, 8)                        # keep 8-row alignment
        buf = np.zeros((nr_pad, blob_cols), np.float32)
        buf[:nr, :nc] = a
        layout[name] = (r, nr, nc)
        chunks.append(buf)
        r += nr_pad
    blob = jnp.asarray(np.concatenate(chunks, axis=0))
    meta = dict(has_ds=has_ds, WN=WN, WN_pad=WN_pad)
    return blob, layout, meta


def _choose_batch_tile(B):
    # >=2 grid steps when possible so v7x's second TensorCore gets work;
    # harmless (short serial loop) on single-TC v5e/v6e.
    if B >= 2 and B % 2 == 0:
        return B // 2
    return B


# ------------------------------ model forward --------------------------------

def tcn_autoencoder_forward(x, blob, *, layout, has_ds, kernel_size,
                            window_size, num_inputs, T, batch_tile,
                            WN, WN_pad, mm_dtype=jnp.float32):
    """x: (B, window_size, num_inputs) f32 -> (B, window_size, num_inputs)."""
    B = x.shape[0]
    assert B % batch_tile == 0
    n_tiles = B // batch_tile
    bt_rows = batch_tile * T

    x_tiled = x.reshape(n_tiles, bt_rows, num_inputs)
    R, BC = blob.shape

    kern = _make_fused_kernel(layout, has_ds, kernel_size, T, mm_dtype)
    out = pl.pallas_call(
        kern,
        out_shape=jax.ShapeDtypeStruct((n_tiles, batch_tile, WN_pad), jnp.float32),
        grid=(n_tiles,),
        in_specs=[
            pl.BlockSpec((None, bt_rows, num_inputs), lambda i: (i, 0, 0)),
            pl.BlockSpec((R, BC), lambda i: (0, 0)),     # resident, no refetch
        ],
        out_specs=pl.BlockSpec((None, batch_tile, WN_pad), lambda i: (i, 0, 0)),
        compiler_params=pltpu.CompilerParams(
            dimension_semantics=("parallel",),
            # No quadratic shift matrices anymore: total VMEM is a few hundred
            # KiB, comfortably inside v7x's 64 MiB physical VMEM as well.
            vmem_limit_bytes=32 * 1024 * 1024,
        ),
    )(x_tiled, blob)
    return out.reshape(B, WN_pad)[:, :WN].reshape(B, window_size, num_inputs)


# ------------------------ deterministic parameters ---------------------------

def init_params(key, num_inputs, num_channels, kernel_size, emb_dim, window_size):
    blocks = []
    cin = num_inputs
    for cout in num_channels:
        key, k1, k2, k3, k4, k5, k6 = jax.random.split(key, 7)
        blk = {
            "w1": 0.01 * jax.random.normal(k1, (kernel_size, cin, cout), jnp.float32),
            "b1": 0.05 * jax.random.normal(k2, (1, cout), jnp.float32),
            "w2": 0.01 * jax.random.normal(k3, (kernel_size, cout, cout), jnp.float32),
            "b2": 0.05 * jax.random.normal(k4, (1, cout), jnp.float32),
        }
        if cin != cout:  # downsample = Conv1d(.., 1) iff n_in != n_out
            blk["wd"] = 0.01 * jax.random.normal(k5, (cin, cout), jnp.float32)
            blk["bd"] = 0.05 * jax.random.normal(k6, (1, cout), jnp.float32)
        blocks.append(blk)
        cin = cout
    key, k1, k2, k3, k4 = jax.random.split(key, 5)
    clast = num_channels[-1]
    wn = window_size * num_inputs
    enc = {"we": jax.random.normal(k1, (clast, emb_dim), jnp.float32) / jnp.sqrt(clast),
           "be": 0.05 * jax.random.normal(k2, (1, emb_dim), jnp.float32)}
    dec = {"wd": jax.random.normal(k3, (emb_dim, wn), jnp.float32) / jnp.sqrt(emb_dim),
           "bd": 0.05 * jax.random.normal(k4, (1, wn), jnp.float32)}
    return {"blocks": blocks, "enc": enc, "dec": dec}


# --------------------------- pure-JAX reference -------------------------------

def reference_forward(x, params, *, kernel_size, window_size, num_inputs):
    B, T, _ = x.shape
    h = x
    for i, blk in enumerate(params["blocks"]):
        d = 2 ** i
        pad = (kernel_size - 1) * d

        def conv(inp, w, b):
            inp_p = jnp.pad(inp, ((0, 0), (pad, 0), (0, 0)))
            acc = jnp.zeros((B, T, w.shape[2]), jnp.float32) + b
            for j in range(kernel_size):
                acc = acc + jnp.einsum("btc,co->bto",
                                       inp_p[:, j * d: j * d + T, :], w[j])
            return jnp.maximum(acc, 0.0)

        h1 = conv(h, blk["w1"], blk["b1"])
        h2 = conv(h1, blk["w2"], blk["b2"])
        if "wd" in blk:
            res = jnp.einsum("btc,co->bto", h, blk["wd"]) + blk["bd"]
        else:
            res = h
        h = jnp.maximum(h2 + res, 0.0)
    pooled = jnp.mean(h, axis=1)
    emb = pooled @ params["enc"]["we"] + params["enc"]["be"]
    out = emb @ params["dec"]["wd"] + params["dec"]["bd"]
    return out.reshape(B, window_size, num_inputs)


# --------------------------------- main ---------------------------------------

if __name__ == "__main__":
    B = 2
    num_inputs = 4
    window_size = 16
    num_channels = [8, 8]
    kernel_size = 2
    emb_dim = 32

    key = jax.random.PRNGKey(0)
    key, xkey, pkey = jax.random.split(key, 3)
    x = jax.random.normal(xkey, (B, window_size, num_inputs), jnp.float32)
    params = init_params(pkey, num_inputs, num_channels, kernel_size,
                         emb_dim, window_size)

    batch_tile = _choose_batch_tile(B)
    blob, layout, meta = pack_params(
        params, kernel_size=kernel_size, window_size=window_size,
        num_inputs=num_inputs, T=window_size, batch_tile=batch_tile)

    fwd = jax.jit(functools.partial(
        tcn_autoencoder_forward,
        layout=layout, has_ds=meta["has_ds"], kernel_size=kernel_size,
        window_size=window_size, num_inputs=num_inputs, T=window_size,
        batch_tile=batch_tile, WN=meta["WN"], WN_pad=meta["WN_pad"],
        mm_dtype=jnp.float32))  # set jnp.bfloat16 on v6e/v7x (loosen tol ~1e-2)
    out = jax.block_until_ready(fwd(x, blob))

    ref = jax.block_until_ready(reference_forward(
        x, params, kernel_size=kernel_size,
        window_size=window_size, num_inputs=num_inputs))

    assert out.shape == (B, window_size, num_inputs), out.shape
    assert bool(jnp.all(jnp.isfinite(out)))
    max_err = float(jnp.max(jnp.abs(out - ref)))
    assert max_err < 1e-3, f"mismatch vs reference: {max_err}"

    print("KERNEL_OK")
</pallas_src>

<mosaic_0001>
module attributes {stable_mosaic.version = 11 : i64} {
  func.func @kernel(%arg0: i32, %arg1: memref<1x16x4xf32, #tpu.memory_space<vmem>>, %arg2: memref<168x128xf32, #tpu.memory_space<vmem>>, %arg3: memref<1x1x128xf32, #tpu.memory_space<vmem>>) attributes {dimension_semantics = [#tpu.dimension_semantics<parallel>], iteration_bounds = array<i64: 2>, scalar_prefetch = 0 : i64, scratch_operands = 0 : i64, tpu.core_type = #tpu.core_type<tc>, window_params = [{transform_indices = @transform_0, window_bounds = array<i64: 1, 16, 4>}, {pipeline_mode = #tpu.pipeline_mode<synchronous>, transform_indices = @transform_1, window_bounds = array<i64: 168, 128>}, {transform_indices = @transform_2, window_bounds = array<i64: 1, 1, 128>}]} {
    %c0 = arith.constant 0 : index
    %c0_0 = arith.constant 0 : index
    %c0_1 = arith.constant 0 : index
    %0 = vector.load %arg1[%c0, %c0_0, %c0_1] : memref<1x16x4xf32, #tpu.memory_space<vmem>>, vector<1x16x4xf32>
    %1 = vector.shape_cast %0 : vector<1x16x4xf32> to vector<16x4xf32>
    %2 = tpu.iota {dimensions = array<i32: 0>} : vector<16x1xi32>
    %c16_i32 = arith.constant 16 : i32
    %c0_i32 = arith.constant 0 : i32
    %3 = arith.cmpi eq, %c16_i32, %c0_i32 : i32
    %c1_i32 = arith.constant 1 : i32
    %4 = arith.select %3, %c1_i32, %c16_i32 : i32
    %5 = vector.broadcast %4 : i32 to vector<16x1xi32>
    %6 = arith.remsi %2, %5 : vector<16x1xi32>
    %c0_i32_2 = arith.constant 0 : i32
    %7 = vector.broadcast %c0_i32_2 : i32 to vector<16x1xi32>
    %8 = arith.cmpi ne, %6, %7 : vector<16x1xi32>
    %c0_i32_3 = arith.constant 0 : i32
    %9 = vector.broadcast %c0_i32_3 : i32 to vector<16x1xi32>
    %10 = arith.cmpi slt, %6, %9 : vector<16x1xi32>
    %c0_i32_4 = arith.constant 0 : i32
    %11 = arith.cmpi slt, %4, %c0_i32_4 : i32
    %12 = vector.broadcast %11 : i1 to vector<16x1xi1>
    %13 = vector.broadcast %12 : vector<16x1xi1> to vector<16x1xi1>
    %14 = arith.xori %10, %13 : vector<16x1xi1>
    %15 = arith.andi %14, %8 : vector<16x1xi1>
    %16 = vector.broadcast %4 : i32 to vector<16x1xi32>
    %17 = arith.addi %6, %16 : vector<16x1xi32>
    %18 = arith.select %15, %17, %6 : vector<16x1xi1>, vector<16x1xi32>
    %c1_i32_5 = arith.constant 1 : i32
    %19 = vector.broadcast %c1_i32_5 : i32 to vector<16x1xi32>
    %20 = arith.cmpi sge, %18, %19 : vector<16x1xi32>
    %c1_i32_6 = arith.constant 1 : i32
    %21 = tpu.dynamic_rotate %1 by %c1_i32_6 dim 0 : vector<16x4xf32>, i32 -> vector<16x4xf32>
    %cst = arith.constant 0.000000e+00 : f32
    %22 = vector.shape_cast %20 : vector<16x1xi1> to vector<16x1xi1>
    %23 = vector.broadcast %22 : vector<16x1xi1> to vector<16x4xi1>
    %24 = vector.broadcast %cst : f32 to vector<16x4xf32>
    %25 = arith.select %23, %21, %24 : vector<16x4xi1>, vector<16x4xf32>
    %26 = tpu.concatenate %25, %1 in 1 : vector<16x4xf32>, vector<16x4xf32> -> vector<16x8xf32>
    %c0_7 = arith.constant 0 : index
    %c0_8 = arith.constant 0 : index
    %27 = vector.load %arg2[%c0_7, %c0_8] : memref<168x128xf32, #tpu.memory_space<vmem>>, vector<8x8xf32>
    %cst_9 = arith.constant dense<0.000000e+00> : vector<16x8xf32>
    %28 = tpu.matmul %26, %27, %cst_9 {dimension_numbers = #tpu.dot_dimension_numbers<[1], [0], [0], [1], [0, 0, 1, 1], [], []>} : vector<16x8xf32>, vector<8x8xf32>, vector<16x8xf32> -> vector<16x8xf32>
    %c8 = arith.constant 8 : index
    %c0_10 = arith.constant 0 : index
    %29 = vector.load %arg2[%c8, %c0_10] : memref<168x128xf32, #tpu.memory_space<vmem>>, vector<1x8xf32>
    %30 = vector.broadcast %29 : vector<1x8xf32> to vector<16x8xf32>
    %31 = arith.addf %28, %30 : vector<16x8xf32>
    %cst_11 = arith.constant 0.000000e+00 : f32
    %32 = vector.broadcast %cst_11 : f32 to vector<16x8xf32>
    %33 = arith.maximumf %31, %32 : vector<16x8xf32>
    %c1_i32_12 = arith.constant 1 : i32
    %34 = tpu.dynamic_rotate %33 by %c1_i32_12 dim 0 : vector<16x8xf32>, i32 -> vector<16x8xf32>
    %cst_13 = arith.constant 0.000000e+00 : f32
    %35 = vector.shape_cast %20 : vector<16x1xi1> to vector<16x1xi1>
    %36 = vector.broadcast %35 : vector<16x1xi1> to vector<16x8xi1>
    %37 = vector.broadcast %cst_13 : f32 to vector<16x8xf32>
    %38 = arith.select %36, %34, %37 : vector<16x8xi1>, vector<16x8xf32>
    %39 = tpu.concatenate %38, %33 in 1 : vector<16x8xf32>, vector<16x8xf32> -> vector<16x16xf32>
    %c16 = arith.constant 16 : index
    %c0_14 = arith.constant 0 : index
    %40 = vector.load %arg2[%c16, %c0_14] : memref<168x128xf32, #tpu.memory_space<vmem>>, vector<16x8xf32>
    %cst_15 = arith.constant dense<0.000000e+00> : vector<16x8xf32>
    %41 = tpu.matmul %39, %40, %cst_15 {dimension_numbers = #tpu.dot_dimension_numbers<[1], [0], [0], [1], [0, 0, 1, 1], [], []>} : vector<16x16xf32>, vector<16x8xf32>, vector<16x8xf32> -> vector<16x8xf32>
    %c32 = arith.constant 32 : index
    %c0_16 = arith.constant 0 : index
    %42 = vector.load %arg2[%c32, %c0_16] : memref<168x128xf32, #tpu.memory_space<vmem>>, vector<1x8xf32>
    %43 = vector.broadcast %42 : vector<1x8xf32> to vector<16x8xf32>
    %44 = arith.addf %41, %43 : vector<16x8xf32>
    %cst_17 = arith.constant 0.000000e+00 : f32
    %45 = vector.broadcast %cst_17 : f32 to vector<16x8xf32>
    %46 = arith.maximumf %44, %45 : vector<16x8xf32>
    %c40 = arith.constant 40 : index
    %c0_18 = arith.constant 0 : index
    %47 = vector.load %arg2[%c40, %c0_18] : memref<168x128xf32, #tpu.memory_space<vmem>>, vector<4x8xf32>
    %cst_19 = arith.constant dense<0.000000e+00> : vector<16x8xf32>
    %48 = tpu.matmul %1, %47, %cst_19 {dimension_numbers = #tpu.dot_dimension_numbers<[1], [0], [0], [1], [0, 0, 1, 1], [], []>} : vector<16x4xf32>, vector<4x8xf32>, vector<16x8xf32> -> vector<16x8xf32>
    %c48 = arith.constant 48 : index
    %c0_20 = arith.constant 0 : index
    %49 = vector.load %arg2[%c48, %c0_20] : memref<168x128xf32, #tpu.memory_space<vmem>>, vector<1x8xf32>
    %50 = vector.broadcast %49 : vector<1x8xf32> to vector<16x8xf32>
    %51 = arith.addf %48, %50 : vector<16x8xf32>
    %52 = arith.addf %46, %51 : vector<16x8xf32>
    %cst_21 = arith.constant 0.000000e+00 : f32
    %53 = vector.broadcast %cst_21 : f32 to vector<16x8xf32>
    %54 = arith.maximumf %52, %53 : vector<16x8xf32>
    %c2_i32 = arith.constant 2 : i32
    %55 = vector.broadcast %c2_i32 : i32 to vector<16x1xi32>
    %56 = arith.cmpi sge, %18, %55 : vector<16x1xi32>
    %c2_i32_22 = arith.constant 2 : i32
    %57 = tpu.dynamic_rotate %54 by %c2_i32_22 dim 0 : vector<16x8xf32>, i32 -> vector<16x8xf32>
    %cst_23 = arith.constant 0.000000e+00 : f32
    %58 = vector.shape_cast %56 : vector<16x1xi1> to vector<16x1xi1>
    %59 = vector.broadcast %58 : vector<16x1xi1> to vector<16x8xi1>
    %60 = vector.broadcast %cst_23 : f32 to vector<16x8xf32>
    %61 = arith.select %59, %57, %60 : vector<16x8xi1>, vector<16x8xf32>
    %62 = tpu.concatenate %61, %54 in 1 : vector<16x8xf32>, vector<16x8xf32> -> vector<16x16xf32>
    %c56 = arith.constant 56 : index
    %c0_24 = arith.constant 0 : index
    %63 = vector.load %arg2[%c56, %c0_24] : memref<168x128xf32, #tpu.memory_space<vmem>>, vector<16x8xf32>
    %cst_25 = arith.constant dense<0.000000e+00> : vector<16x8xf32>
    %64 = tpu.matmul %62, %63, %cst_25 {dimension_numbers = #tpu.dot_dimension_numbers<[1], [0], [0], [1], [0, 0, 1, 1], [], []>} : vector<16x16xf32>, vector<16x8xf32>, vector<16x8xf32> -> vector<16x8xf32>
    %c72 = arith.constant 72 : index
    %c0_26 = arith.constant 0 : index
    %65 = vector.load %arg2[%c72, %c0_26] : memref<168x128xf32, #tpu.memory_space<vmem>>, vector<1x8xf32>
    %66 = vector.broadcast %65 : vector<1x8xf32> to vector<16x8xf32>
    %67 = arith.addf %64, %66 : vector<16x8xf32>
    %cst_27 = arith.constant 0.000000e+00 : f32
    %68 = vector.broadcast %cst_27 : f32 to vector<16x8xf32>
    %69 = arith.maximumf %67, %68 : vector<16x8xf32>
    %c2_i32_28 = arith.constant 2 : i32
    %70 = tpu.dynamic_rotate %69 by %c2_i32_28 dim 0 : vector<16x8xf32>, i32 -> vector<16x8xf32>
    %cst_29 = arith.constant 0.000000e+00 : f32
    %71 = vector.shape_cast %56 : vector<16x1xi1> to vector<16x1xi1>
    %72 = vector.broadcast %71 : vector<16x1xi1> to vector<16x8xi1>
    %73 = vector.broadcast %cst_29 : f32 to vector<16x8xf32>
    %74 = arith.select %72, %70, %73 : vector<16x8xi1>, vector<16x8xf32>
    %75 = tpu.concatenate %74, %69 in 1 : vector<16x8xf32>, vector<16x8xf32> -> vector<16x16xf32>
    %c80 = arith.constant 80 : index
    %c0_30 = arith.constant 0 : index
    %76 = vector.load %arg2[%c80, %c0_30] : memref<168x128xf32, #tpu.memory_space<vmem>>, vector<16x8xf32>
    %cst_31 = arith.constant dense<0.000000e+00> : vector<16x8xf32>
    %77 = tpu.matmul %75, %76, %cst_31 {dimension_numbers = #tpu.dot_dimension_numbers<[1], [0], [0], [1], [0, 0, 1, 1], [], []>} : vector<16x16xf32>, vector<16x8xf32>, vector<16x8xf32> -> vector<16x8xf32>
    %c96 = arith.constant 96 : index
    %c0_32 = arith.constant 0 : index
    %78 = vector.load %arg2[%c96, %c0_32] : memref<168x128xf32, #tpu.memory_space<vmem>>, vector<1x8xf32>
    %79 = vector.broadcast %78 : vector<1x8xf32> to vector<16x8xf32>
    %80 = arith.addf %77, %79 : vector<16x8xf32>
    %cst_33 = arith.constant 0.000000e+00 : f32
    %81 = vector.broadcast %cst_33 : f32 to vector<16x8xf32>
    %82 = arith.maximumf %80, %81 : vector<16x8xf32>
    %83 = arith.addf %82, %54 : vector<16x8xf32>
    %cst_34 = arith.constant 0.000000e+00 : f32
    %84 = vector.broadcast %cst_34 : f32 to vector<16x8xf32>
    %85 = arith.maximumf %83, %84 : vector<16x8xf32>
    %c104 = arith.constant 104 : index
    %c0_35 = arith.constant 0 : index
    %86 = vector.load %arg2[%c104, %c0_35] : memref<168x128xf32, #tpu.memory_space<vmem>>, vector<1x16xf32>
    %cst_36 = arith.constant dense<0.000000e+00> : vector<1x8xf32>
    %87 = tpu.matmul %86, %85, %cst_36 {dimension_numbers = #tpu.dot_dimension_numbers<[1], [0], [0], [1], [0, 0, 1, 1], [], []>} : vector<1x16xf32>, vector<16x8xf32>, vector<1x8xf32> -> vector<1x8xf32>
    %c112 = arith.constant 112 : index
    %c0_37 = arith.constant 0 : index
    %88 = vector.load %arg2[%c112, %c0_37] : memref<168x128xf32, #tpu.memory_space<vmem>>, vector<8x32xf32>
    %cst_38 = arith.constant dense<0.000000e+00> : vector<1x32xf32>
    %89 = tpu.matmul %87, %88, %cst_38 {dimension_numbers = #tpu.dot_dimension_numbers<[1], [0], [0], [1], [0, 0, 1, 1], [], []>} : vector<1x8xf32>, vector<8x32xf32>, vector<1x32xf32> -> vector<1x32xf32>
    %c120 = arith.constant 120 : index
    %c0_39 = arith.constant 0 : index
    %90 = vector.load %arg2[%c120, %c0_39] : memref<168x128xf32, #tpu.memory_space<vmem>>, vector<1x32xf32>
    %91 = arith.addf %89, %90 : vector<1x32xf32>
    %c128 = arith.constant 128 : index
    %c0_40 = arith.constant 0 : index
    %92 = vector.load %arg2[%c128, %c0_40] : memref<168x128xf32, #tpu.memory_space<vmem>>, vector<32x128xf32>
    %cst_41 = arith.constant dense<0.000000e+00> : vector<1x128xf32>
    %93 = tpu.matmul %91, %92, %cst_41 {dimension_numbers = #tpu.dot_dimension_numbers<[1], [0], [0], [1], [0, 0, 1, 1], [], []>} : vector<1x32xf32>, vector<32x128xf32>, vector<1x128xf32> -> vector<1x128xf32>
    %c160 = arith.constant 160 : index
    %c0_42 = arith.constant 0 : index
    %94 = vector.load %arg2[%c160, %c0_42] : memref<168x128xf32, #tpu.memory_space<vmem>>, vector<1x128xf32>
    %95 = arith.addf %93, %94 : vector<1x128xf32>
    %c0_43 = arith.constant 0 : index
    %c0_44 = arith.constant 0 : index
    %c0_45 = arith.constant 0 : index
    %96 = vector.load %arg3[%c0_43, %c0_44, %c0_45] : memref<1x1x128xf32, #tpu.memory_space<vmem>>, vector<1x1x128xf32>
    %97 = vector.shape_cast %96 : vector<1x1x128xf32> to vector<1x128xf32>
    %98 = vector.shape_cast %95 : vector<1x128xf32> to vector<1x1x128xf32>
    tpu.vector_store %arg3[%c0_43, %c0_44, %c0_45], %98 {strides = array<i32>} : memref<1x1x128xf32, #tpu.memory_space<vmem>>, vector<1x1x128xf32>,
    return
  }
  func.func @transform_0(%arg0: i32) -> (i32, i32, i32) {
    %c0_i32 = arith.constant 0 : i32
    %c0_i32_0 = arith.constant 0 : i32
    %c0_i32_1 = arith.constant 0 : i32
    return %arg0, %c0_i32, %c0_i32_0 : i32, i32, i32
  }
  func.func @transform_1(%arg0: i32) -> (i32, i32) {
    %c0_i32 = arith.constant 0 : i32
    %c0_i32_0 = arith.constant 0 : i32
    %c0_i32_1 = arith.constant 0 : i32
    return %c0_i32, %c0_i32_0 : i32, i32
  }
  func.func @transform_2(%arg0: i32) -> (i32, i32, i32) {
    %c0_i32 = arith.constant 0 : i32
    %c0_i32_0 = arith.constant 0 : i32
    %c0_i32_1 = arith.constant 0 : i32
    return %arg0, %c0_i32, %c0_i32_0 : i32, i32, i32
  }
}

</mosaic_0001>

<bundles_post_ra>
// kernel: tcn_autoencoder_forward.1
= control target key start
LH: loop header
LB: loop body
LE: loop exit
PB: predicated region body
PF: predicated region fallthrough
CT: control target
= control target key end

     0   :  { %7 = vsyncpa [#allocation3], 0  ;;  %s1232_s9 = smov 0   ;;  %s1364_s0 = inlined_call_operand.vmem [shape: f32[2,16,4], index: 0, kind: input, shape index: {}]   ;;  %s1365_s1 = inlined_call_operand.hbm [shape: f32[168,128], index: 1, kind: input, shape index: {}]   ;;  %s1366_s2 = inlined_call_operand.vmem [shape: f32[2,1,128], index: 2, kind: output, shape index: {}]  }
   0x1 LB: > { %s1238_s10 = sadd.s32 4294967295, %s1207_s9   ;;  %p1011_p0 = scmp.ge.s32.totalorder %s1207_s9, 1  ;;  %s1207_s9 = sphi %s1232_s9, %s13_s9  }
   0x2   : > { %p91_p1 = scmp.lt.s32.totalorder %s1207_s9, 3  ;;  %s1209_s11 = smov [#allocation2]  }
   0x3   : > { %s103_s12 = sshll.u32 %s1209_s11, 4  ;;  %p1367_p3 = scmp.eq.s32.totalorder %s1238_s10, 0  ;;  %s104_s12 = int_to_ptr.vmem [resolvable:$true] %s103_s12 }
   0x4   : > { %p1242_p2 = pnand %p1011_p0, %p91_p1  ;;  %s1169_s17 = scalar_lea.hbm %s1365_s1, 2688 }
   0x5   : > { %p1170_p6 = scmp.ne.s32.totalorder %s1365_s1, %s1169_s17  ;;  %p1176_p10 = scmp.lt.u32.totalorder %s1169_s17, %s1365_s1 }
   0x6   : > { %s1369_s13 = scalar_select %p1242_p2, 1, 0 }
   0x7   : > { %p1147_p4 = pneg %p1242_p2 }
   0x9   : > { %p1251_p5 = pnand %p1367_p3, %p1147_p4 }
   0xb   : > { %p1171_p7 = pneg %p1251_p5 }
   0xd   : > { %p1172_p8 = pnand %p1171_p7, %p1170_p6 }
   0xf   : > { %p1173_p9 = pneg %p1172_p8 }
  0x11   : > { %p1178_p11 = pnand %p1176_p10, %p1173_p9 }
  0x13   : > { %1181 = shalt.err (!%p1178_p11)
}
  0x14   : > { %s1182_s22 = scalar_lea.vmem %s104_s12, 2688  ;;  %p1190_p1 = scmp.lt.s32.totalorder %s104_s12, %s104_s12 }
  0x15   : > { %p1183_p12 = scmp.ne.s32.totalorder %s104_s12, %s1182_s22  ;;  %p1191_p4 = scmp.lt.s32.totalorder %s1182_s22, %s1182_s22 }
  0x17   : > { %p1185_p13 = pnand %p1183_p12, %p1171_p7  ;;  %p1192_p3 = por %p1191_p4, %p1190_p1 }
  0x19   : > { %p1186_p0 = pneg %p1185_p13 }
  0x1b   : > { %p1193_p2 = pnand %p1192_p3, %p1186_p0 }
  0x1d   : > { %1196 = shalt.err (!%p1193_p2)
}
  0x1e   : > { %s1210_s23 = smov 128   ;;  %s1211_s24 = smov 8  }
  0x1f   : > { %1150 = dma.hbm_to_vmem [thread:$0]  (!%p1251_p5), %s1365_s1, 2688, %s104_s12, [#allocation3], %s1210_s23, %s1210_s23, %s1211_s24  }
  0x20   : > { %p1371_p6 = scmp.ne.s32.totalorder %s1369_s13, 0 }
  0x21   : > { %p1372_p8 = scmp.eq.s32.totalorder (!%p1371_p6), %s1238_s10, 0 }
  0x22   : > { %127 = sbr.rel (%p1371_p6) target bundleno = 2046 (0x7fe), region = 28 }
  0x29   : > { %1202 = dma.done.wait (%p1372_p8), [#allocation3], 2688   ;;  %p1373_p7 = pmov %p1372_p8 }
  0x2a   : > { %p147_p2 = scmp.lt.s32.totalorder %s1238_s10, 1  ;;  %v208_v1 = vld [vmem:[#allocation2] sm:$0xff]  ;;  %s1212_s3 = smov 4   ;;  %v157_v3 = vlaneseq  ;;  %vm205_vm2 = vcmask 31744   ;;  %vm214_vm3 = vcmask 64512   ;;  %v314_v16 = vld [vmem:[#allocation2 + $0x10] sm:$0xff] }
  0x2b   : > { %1204 = vsyncadd (%p1373_p7), [#allocation3], 4294964608  ;;  %1068 = vmatprep.subr.mxu0 %v208_v1  ;;  %v315_v17 = vld [vmem:[#allocation2 + $0x18] sm:$0xff]  ;;  %v1018_v19 = vld [vmem:[#allocation2 + $0x8] ss:$0 sm:$0xff]  ;;  %vm415_vm4 = vcmask 1043456  }
  0x2c   : > { %s1379_s10 = smov (!%p147_p2, %s1238_s10), 1  ;;  %1069 = vmatpush3.msra.mxu0 %v208_v1  ;;  %v1285_v4 = vshrl.u32 %v157_v3, 7  ;;  %v1122_v18 = vpack.c.bf16 %v315_v17, %v314_v16  ;;  %v405_v20 = vld [vmem:[#allocation2 + $0x28] sm:$0xf]  ;;  %s1213_s4 = smov 8   ;;  %vm321_vm5 = vcmask 130048  }
  0x2d   : > { %s1039_s27 = sshll.u32 %s1379_s10, 4  ;;  %v521_v36 = vld [vmem:[#allocation2 + $0x38] sm:$0xff]  ;;  %v522_v37 = vld [vmem:[#allocation2 + $0x40] sm:$0xff]  ;;  %v1024_v44 = vld [vmem:[#allocation2 + $0x30] ss:$0 sm:$0xff]  ;;  %vm1215_vm8 = vmmov 0   ;;  %s154_s7 = scalar_lea.vmem %s1366_s2, %s1379_s10 }
  0x2e   : > { %s151_s30 = scalar_lea.vmem %s1364_s0, %s1039_s27  ;;  %v164_v7 = vand.u32 15, %v1285_v4  ;;  %vm188_vm0 = vcmp.lt.s32.totalorder %v1285_v4, 1  ;;  %1123 = vmatprep.subr.bf16.mxu0 %v1122_v18  ;;  %v1126_v38 = vpack.c.bf16 %v522_v37, %v521_v36  ;;  %v1021_v39 = vld [vmem:[#allocation2 + $0x20] ss:$0 sm:$0xff]  ;;  %vm502_vm6 = vcmp.lt.s32.totalorder %v1285_v4, 2  ;;  %v627_v1 = vld [vmem:[#allocation2 + $0x50] sm:$0xff] }
  0x2f   : > { %v155_v0 = vld [vmem:[%s151_s30] sm:$0xff]  ;;  %v156_v2 = vld [vmem:[%s151_s30 + $0x8] sm:$0xff]  ;;  %v795_v4 = vld [vmem:[#allocation2 + $0x70] sm:$0xff]  ;;  %vm875_vm9 = vcmask 261120  }
  0x30   : > { %199 = vrot.lane.b32.xlu0 %v155_v0, %s1212_s3  ;;  %v186_v5 = vrot.slane %v155_v0, 7  ;;  %v187_v6 = vrot.slane %v156_v2, 7  ;;  %vm1291_vm1 = vcmp.ge.s32.totalorder %v164_v7, 1  ;;  %1127 = vmatprep.subr.bf16.mxu1 %v1126_v38  ;;  %vm1326_vm7 = vcmp.ge.s32.totalorder %v164_v7, 2  ;;  %v870_v36 = vld [vmem:[#allocation2 + $0x80] sm:$0xff]  ;;  %v871_v37 = vld [vmem:[#allocation2 + $0x88] sm:$0xff] }
  0x31   : > { %1129 = vmatpush3.bf16.msra.mxu1 %v1126_v38  ;;  %v1138_v38 = vpack.c.bf16 %v871_v37, %v870_v36 }
  0x32   : > { %v190_v9 = vsel %vm188_vm0, %v187_v6, %v186_v5  ;;  %v189_v13 = vsel %vm188_vm0, %v186_v5, %v187_v6  ;;  %v1028_v5 = vld [vmem:[#allocation2 + $0x48] ss:$0 sm:$0xff] }
  0x33   : > { %v195_v10 = vsel %vm1291_vm1, %v190_v9, 0.0 }
  0x34   : > { %201 = vrot.lane.b32.xlu0 %v156_v2, %s1212_s3 }
  0xa2   : > { %v200_v11 = vpop.permute.xlu0 %199 }
  0xa3   : > { %v206_v12 = vsel %vm205_vm2, %v195_v10, %v200_v11 }
  0xa4   : > { %1070 = vmatprep.mubr.msk.f32.mxu0 %vm214_vm3, %v206_v12 }
  0xa6   : > { %v202_v14 = vpop.permute.xlu0 %201 }
  0xa7   : > { %v207_v15 = vsel %vm205_vm2, %v189_v13, %v202_v14 }
  0xa8   : > { %1071 = vmatmul.mubr.msk.f32.vlgmr.msra.gmra.mrb[0].mxu0 %vm214_vm3, %v207_v15 }
  0xa9   : > { %1125 = vmatpush3.bf16.msra.mxu0 %v1122_v18 }
  0xaa   : > { %1080 = vmatprep.subr.msk.mxu0 %vm415_vm4, %v405_v20 }
 0x17b   : > { %v1072_v21 = vpop.f32.mrb[0].mxu0 }
 0x17c   : > { %v293_v22 = vadd.f32 %v1072_v21, %v1018_v19  ;;  %v287_v23 = vpop.f32.mrb[1].mxu0  ;;  %v1214_v21 = vmov 0.0|0.0  }
 0x17d   : > { %v288_v24 = vadd.f32 %v1018_v19, %v287_v23  ;;  %1134 = vmatprep.subr.bf16.mxu1 %v1214_v21  ;;  %v1031_v23 = vld [vmem:[#allocation2 + $0x60] ss:$0 sm:$0xff] }
 0x17e   : > { %v297_v25 = vmax.f32 %v293_v22, 0.0  ;;  %v1216_v22 = vmov 0.0  }
 0x17f   : > { %v296_v26 = vmax.f32 %v288_v24, 0.0 }
 0x180   : > { %v299_v27 = vrot.slane %v297_v25, 7 }
 0x181   : > { %v298_v28 = vrot.slane %v296_v26, 7  ;;  %306 = vrot.lane.b32.xlu1 %v296_v26, %s1213_s4 }
 0x183   : > { %v301_v29 = vsel %vm188_vm0, %v299_v27, %v298_v28  ;;  %v300_v30 = vsel %vm188_vm0, %v298_v28, %v299_v27 }
 0x184   : > { %v302_v32 = vsel %vm1291_vm1, %v301_v29, 0.0 }
 0x185   : > { %308 = vrot.lane.b32.xlu1 %v297_v25, %s1213_s4 }
 0x1f3   : > { %v307_v31 = vpop.permute.xlu1 %306 }
 0x1f4   : > { %v312_v33 = vsel %vm214_vm3, %v302_v32, %v307_v31 }
 0x1f5   : > { %1077 = vmatprep.mubr.msk.f32.mxu0 %vm321_vm5, %v312_v33 }
 0x1f7   : > { %v309_v34 = vpop.permute.xlu1 %308 }
 0x1f8   : > { %v313_v35 = vsel %vm214_vm3, %v300_v30, %v309_v34 }
 0x1f9   : > { %1078 = vmatmul.mubr.msk.f32.vlgmr.msra.gmra.mrb[2].mxu0 %vm321_vm5, %v313_v35  ;;  %v721_v35 = vld [vmem:[#allocation2 + $0x68] sm:$0x1] }
 0x1fa   : > { %1081 = vmatpush3.msk.msra.mxu0 %vm415_vm4, %v405_v20  ;;  %1082 = vmatprep.mubr.msk.f32.mxu0 %vm205_vm2, %v155_v0 }
 0x1fd   : > { %1083 = vmatmul.mubr.msk.f32.vlgmr.msra.gmra.mrb[4].mxu0 %vm205_vm2, %v156_v2  ;;  %v628_v2 = vld [vmem:[#allocation2 + $0x58] sm:$0xff] }
 0x1fe   : > { %v1130_v3 = vpack.c.bf16 %v628_v2, %v627_v1 }
 0x200   : > { %1131 = vmatprep.subr.bf16.mxu0 %v1130_v3 }
 0x201   : > { %1133 = vmatpush3.bf16.msra.mxu0 %v1130_v3 }
 0x202   : > { %1106 = vmatprep.subr.mxu0 %v1216_v22 }
 0x2cc   : > { %v1079_v40 = vpop.f32.mrb[2].mxu0 }
 0x2cd   : > { %v400_v41 = vadd.f32 %v1079_v40, %v1021_v39  ;;  %v394_v42 = vpop.f32.mrb[3].mxu0 }
 0x2ce   : > { %v395_v43 = vadd.f32 %v1021_v39, %v394_v42  ;;  %v873_v42 = vld [vmem:[#allocation2 + $0x98] sm:$0xff] }
 0x2cf   : > { %v404_v46 = vmax.f32 %v400_v41, 0.0  ;;  %v872_v41 = vld [vmem:[#allocation2 + $0x90] sm:$0xff] }
 0x2d0   : > { %v1084_v45 = vpop.f32.mrb[4].mxu0  ;;  %v403_v49 = vmax.f32 %v395_v43, 0.0  ;;  %v1141_v43 = vpack.c.bf16 %v873_v42, %v872_v41 }
 0x2d1   : > { %v491_v47 = vadd.f32 %v1084_v45, %v1024_v44  ;;  %v485_v48 = vpop.f32.mrb[5].mxu0 }
 0x2d2   : > { %v486_v50 = vadd.f32 %v1024_v44, %v485_v48  ;;  %v796_v44 = vld [vmem:[#allocation2 + $0x78] sm:$0x1]  ;;  %v874_v48 = vld [vmem:[#allocation2 + $0xa0] sm:$0x1] }
 0x2d3   : > { %v495_v51 = vadd.f32 %v491_v47, %v404_v46 }
 0x2d4   : > { %v494_v52 = vadd.f32 %v486_v50, %v403_v49 }
 0x2d5   : > { %v497_v53 = vmax.f32 %v495_v51, 0.0 }
 0x2d6   : > { %v496_v54 = vmax.f32 %v494_v52, 0.0 }
 0x2d7   : > { %515 = vrot.lane.b32.xlu1 %v497_v53, %s1213_s4  ;;  %v501_v55 = vrot.slane %v497_v53, 6 }
 0x2d8   : > { %513 = vrot.lane.b32.xlu0 %v496_v54, %s1213_s4  ;;  %v500_v56 = vrot.slane %v496_v54, 6 }
 0x2da   : > { %v504_v58 = vsel %vm502_vm6, %v501_v55, %v500_v56  ;;  %v503_v62 = vsel %vm502_vm6, %v500_v56, %v501_v55 }
 0x2db   : > { %v509_v61 = vsel %vm1326_vm7, %v504_v58, 0.0 }
 0x349   : > { %v516_v59 = vpop.permute.xlu1 %515 }
 0x34a   : > { %v514_v60 = vpop.permute.xlu0 %513  ;;  %v520_v0 = vsel %vm214_vm3, %v503_v62, %v516_v59 }
 0x34b   : > { %v519_v63 = vsel %vm214_vm3, %v509_v61, %v514_v60 }
 0x34c   : > { %1089 = vmatprep.mubr.msk.f32.mxu1 %vm321_vm5, %v519_v63 }
 0x34d   : > { %1090 = vmatmul.mubr.msk.f32.vlgmr.msra.gmra.mrb[0].mxu1 %vm321_vm5, %v520_v0 }
 0x34e   : > { %1103 = vmatprep.mubr.msk.f32.mxu1 %vm1215_vm8, %v1216_v22 }
 0x420   : > { %v1091_v6 = vpop.f32.mrb[0].mxu1 }
 0x421   : > { %v606_v7 = vadd.f32 %v1091_v6, %v1028_v5  ;;  %v600_v8 = vpop.f32.mrb[1].mxu1 }
 0x422   : > { %v601_v9 = vadd.f32 %v1028_v5, %v600_v8 }
 0x423   : > { %v610_v10 = vmax.f32 %v606_v7, 0.0 }
 0x424   : > { %v609_v11 = vmax.f32 %v601_v9, 0.0 }
 0x425   : > { %v612_v12 = vrot.slane %v610_v10, 6  ;;  %621 = vrot.lane.b32.xlu1 %v610_v10, %s1213_s4 }
 0x426   : > { %v611_v13 = vrot.slane %v609_v11, 6  ;;  %619 = vrot.lane.b32.xlu0 %v609_v11, %s1213_s4 }
 0x428   : > { %v613_v14 = vsel %vm502_vm6, %v611_v13, %v612_v12  ;;  %v614_v15 = vsel %vm502_vm6, %v612_v12, %v611_v13 }
 0x429   : > { %v615_v18 = vsel %vm1326_vm7, %v614_v15, 0.0 }
 0x497   : > { %v622_v16 = vpop.permute.xlu1 %621 }
 0x498   : > { %v620_v17 = vpop.permute.xlu0 %619  ;;  %v626_v20 = vsel %vm214_vm3, %v613_v14, %v622_v16 }
 0x499   : > { %v625_v19 = vsel %vm214_vm3, %v615_v18, %v620_v17 }
 0x49a   : > { %1096 = vmatprep.mubr.msk.f32.mxu0 %vm321_vm5, %v625_v19 }
 0x49b   : > { %1097 = vmatmul.mubr.msk.f32.vlgmr.msra.gmra.mrb[6].mxu0 %vm321_vm5, %v626_v20 }
 0x49c   : > { %1108 = vmatprep.mubr.msk.f32.mxu0 %vm1215_vm8, %v1216_v22  ;;  %1107 = vmatpush3.msra.mxu0 %v795_v4 }
 0x56e   : > { %v1098_v24 = vpop.f32.mrb[6].mxu0 }
 0x56f   : > { %v712_v25 = vadd.f32 %v1098_v24, %v1031_v23  ;;  %v706_v26 = vpop.f32.mrb[7].mxu0 }
 0x570   : > { %v707_v27 = vadd.f32 %v1031_v23, %v706_v26 }
 0x571   : > { %v716_v28 = vmax.f32 %v712_v25, 0.0 }
 0x572   : > { %v715_v29 = vmax.f32 %v707_v27, 0.0 }
 0x573   : > { %v718_v30 = vadd.f32 %v716_v28, %v497_v53 }
 0x574   : > { %v717_v31 = vadd.f32 %v715_v29, %v496_v54 }
 0x575   : > { %v720_v32 = vmax.f32 %v718_v30, 0.0 }
 0x576   : > { %v719_v33 = vmax.f32 %v717_v31, 0.0 }
 0x578   : > { %v1135_v34 = vpack.c.bf16 %v720_v32, %v719_v33 }
 0x57a   : > { %1136 = vmatpush3.bf16.msra.mxu1 %v1135_v34 }
 0x57b   : > { %1137 = vmatprep.subr.bf16.mxu1 %v1214_v21 }
 0x57d   : > { %1104 = vmatmul.mubr.msk.f32.vlgmr.msra.gmra.mrb[2].mxu1 %vm321_vm5, %v721_v35 }
 0x57e   : > { %1119 = vmatprep.mubr.msk.f32.mxu1 %vm1215_vm8, %v1216_v22  ;;  %1139 = vmatpush3.bf16.msra.mxu1 %v1138_v38 }
 0x57f   : > { %1140 = vmatprep.subr.bf16.mxu1 %v1214_v21 }
 0x582   : > { %1142 = vmatpush3.bf16.msra.mxu1 %v1141_v43 }
 0x650   : > { %v791_v39 = vpop.f32.mrb[2].mxu1 }
 0x651   : > { %v1105_v40 = vpop.f32.mrb[3].mxu1  ;;  %1109 = vmatmul.mubr.msk.f32.vlgmr.msra.gmra.mrb[8].mxu0 %vm214_vm3, %v791_v39 }
 0x724   : > { %v866_v45 = vpop.f32.mrb[8].mxu0 }
 0x725   : > { %v867_v46 = vadd.f32 %v866_v45, %v796_v44  ;;  %v1110_v47 = vpop.f32.mrb[9].mxu0 }
 0x727   : > { %1120 = vmatmul.mubr.msk.f32.vlgmr.msra.gmra.mrb[4].mxu1 %vm875_vm9, %v867_v46 }
 0x7fa   : > { %v945_v49 = vpop.f32.mrb[4].mxu1 }
 0x7fb   : > { %v946_v50 = vadd.f32 %v945_v49, %v874_v48  ;;  %v1121_v51 = vpop.f32.mrb[5].mxu1 }
 0x7fd   : > { %949 = vst [vmem:[%s154_s7] sm:$0x1] %v946_v50 }
 0x7fe PF: > { %s13_s9 = sadd.s32 1, %s1207_s9  }
 0x7ff   : > { %p10_p3 = scmp.ge.s32.totalorder %s13_s9, 4  }
 0x801   :  { %12 = sbr.rel (!%p10_p3) target bundleno = 1 (0x1), region = 63 }
 0x808   :  { %967 = vsyncpa [#allocation3], 1 }
 0x809   :  { %969 = vsyncpa [#allocation3 + $0x1], 1 }

</bundles_post_ra>
